<compile_context>
chip_gen: v7x
topology: tpu7x:2x2x1
jax: 0.10.0
libtpu: 0.0.40
codegen_flags: <defaults>
</compile_context>

<pallas_src>
import math

import jax
import jax.numpy as jnp
from jax.experimental import pallas as pl
from jax.experimental.pallas import tpu as pltpu


def _round_up(v, m):
    return ((v + m - 1) // m) * m


# ---------------------------------------------------------------------------
# Kernels
# ---------------------------------------------------------------------------
def layer1_kernel(x_ref, w1_ref, b1_ref, h_ref):
    """H = tanh(x @ W1 + b1): f32 MXU matmul + f32 bias/tanh, bf16 output."""
    h = jnp.dot(x_ref[...], w1_ref[...], preferred_element_type=jnp.float32)
    h_ref[...] = jnp.tanh(h + b1_ref[...]).astype(h_ref.dtype)


def layer2_kernel(h_ref, w2_ref, b2_ref, o_ref):
    """out = H @ W2 + b2: bf16 MXU matmul, f32 accumulate, f32 bias add."""
    out = jnp.dot(h_ref[...], w2_ref[...], preferred_element_type=jnp.float32)
    o_ref[...] = (out + b2_ref[...]).astype(o_ref.dtype)


# ---------------------------------------------------------------------------
# One-time parameter preparation (pad + cast OUTSIDE the per-call path)
# ---------------------------------------------------------------------------
def prepare_decoder_params(w1, b1, w2, b2, *, tn=2048):
    """Pad + cast the Decoder parameters once.

    Weights are stored (in_features, out_features), i.e. transposed vs. PyTorch.
    Zero padding is a mathematical no-op: padded x/W1 columns/rows are zero,
    padded H columns are tanh(0 + 0) = 0, padded W2 rows are zero.
    """
    D0, D1 = w1.shape
    D1_, D2 = w2.shape
    assert D1 == D1_ and b1.shape == (D1,) and b2.shape == (D2,)

    D0p = _round_up(D0, 128)
    D1p = _round_up(D1, 128)
    tn = min(_round_up(tn, 128), _round_up(D2, 128))   # lane-dense output tile
    D2p = _round_up(D2, tn)                            # tn divides padded D2

    w1p = jnp.pad(w1, ((0, D0p - D0), (0, D1p - D1))).astype(jnp.float32)
    b1p = jnp.pad(b1, (0, D1p - D1)).reshape(1, D1p).astype(jnp.float32)
    w2p = jnp.pad(w2, ((0, D1p - D1), (0, D2p - D2))).astype(jnp.bfloat16)
    b2p = jnp.pad(b2, (0, D2p - D2)).reshape(1, D2p).astype(jnp.float32)

    return dict(w1=w1p, b1=b1p, w2=w2p, b2=b2p, d0=D0, d1=D1, d2=D2, tn=tn)


# ---------------------------------------------------------------------------
# Forward
# ---------------------------------------------------------------------------
def decoder_forward(x, params, *, tm=None):
    """Fused Decoder forward: out = tanh(x @ W1 + b1) @ W2 + b2."""
    M, D0 = x.shape
    assert D0 == params["d0"], "input feature dim mismatch"
    w1p, b1p, w2p, b2p = params["w1"], params["b1"], params["w2"], params["b2"]
    D0p, D1p = w1p.shape
    D2p = w2p.shape[1]
    tn = params["tn"]
    D2 = params["d2"]
    out_dtype = x.dtype

    # --- adaptive batch tile: multiple of 16 (bf16 sublane), sized near M ----
    M16 = _round_up(M, 16)
    if tm is None:
        n_m = (M16 + 511) // 512                 # at most 512 rows / tile
        tm = _round_up(-(-M16 // n_m), 16)       # ... but sized near M
    else:
        tm = _round_up(tm, 16)
        n_m = -(-M16 // tm)
    Mp = tm * n_m

    xp = jnp.pad(x, ((0, Mp - M), (0, D0p - D0))).astype(jnp.float32)

    vmem_limit = 48 * 1024 * 1024   # safe on v5e/v6e (128 MiB) and v7x (64 MiB)

    # --- pass 1: H = tanh(x @ W1 + b1), f32 compute, bf16 materialization ----
    h = pl.pallas_call(
        layer1_kernel,
        out_shape=jax.ShapeDtypeStruct((Mp, D1p), jnp.bfloat16),
        grid_spec=pltpu.PrefetchScalarGridSpec(
            num_scalar_prefetch=0,
            grid=(n_m,),
            in_specs=[
                pl.BlockSpec((tm, D0p), lambda i: (i, 0)),    # x batch tile
                pl.BlockSpec((D0p, D1p), lambda i: (0, 0)),   # W1 (whole, small)
                pl.BlockSpec((1, D1p), lambda i: (0, 0)),     # b1
            ],
            out_specs=pl.BlockSpec((tm, D1p), lambda i: (i, 0)),
        ),
        compiler_params=pltpu.CompilerParams(
            dimension_semantics=("parallel",),
            vmem_limit_bytes=vmem_limit,
        ),
    )(xp, w1p, b1p)

    # --- pass 2: out = H @ W2 + b2 -------------------------------------------
    # Grid: output-feature tiles OUTER (megacore-sharded), batch tiles INNER.
    # W2/b2 block indices depend only on the outer axis -> DMA'd once per tile.
    n_d2 = D2p // tn
    out = pl.pallas_call(
        layer2_kernel,
        out_shape=jax.ShapeDtypeStruct((Mp, D2p), out_dtype),
        grid_spec=pltpu.PrefetchScalarGridSpec(
            num_scalar_prefetch=0,
            grid=(n_d2, n_m),
            in_specs=[
                pl.BlockSpec((tm, D1p), lambda j, i: (i, 0)),   # H batch tile
                pl.BlockSpec((D1p, tn), lambda j, i: (0, j)),   # W2 output tile
                pl.BlockSpec((1, tn), lambda j, i: (0, j)),     # b2 output tile
            ],
            out_specs=pl.BlockSpec((tm, tn), lambda j, i: (i, j)),
        ),
        compiler_params=pltpu.CompilerParams(
            dimension_semantics=("parallel", "arbitrary"),
            vmem_limit_bytes=vmem_limit,
        ),
    )(h, w2p, b2p)

    if Mp == M and D2p == D2:
        return out
    return out[:M, :D2]


# ---------------------------------------------------------------------------
# Init / reference
# ---------------------------------------------------------------------------
def init_decoder_params(key, p_dims):
    """Deterministic init matching the PyTorch module:
    xavier_uniform_ on Linear weights, Normal(0, 0.001) on biases."""
    d0, d1, d2 = p_dims
    k1, k2, k3, k4 = jax.random.split(key, 4)

    def xavier_uniform(k, fan_in, fan_out):
        bound = math.sqrt(6.0 / (fan_in + fan_out))
        # stored as (in, out) so the kernel computes x @ W (== x @ W_torch.T)
        return jax.random.uniform(k, (fan_in, fan_out), jnp.float32,
                                  minval=-bound, maxval=bound)

    w1 = xavier_uniform(k1, d0, d1)
    b1 = 0.001 * jax.random.normal(k2, (d1,), jnp.float32)
    w2 = xavier_uniform(k3, d1, d2)
    b2 = 0.001 * jax.random.normal(k4, (d2,), jnp.float32)
    return w1, b1, w2, b2


def decoder_reference(x, w1, b1, w2, b2):
    h = jnp.tanh(x @ w1 + b1)
    return h @ w2 + b2


if __name__ == "__main__":
    # Small shapes with the same 2-layer MLP structure as the original module
    # (original p_dims=[200, 600, 20108]); deliberately non-128-aligned to
    # exercise the padding path.  tm/tn chosen small so the test exercises a
    # multi-tile 2-D grid (3 output tiles x 3 batch tiles).
    batch = 40
    p_dims = [100, 200, 300]

    key = jax.random.PRNGKey(0)
    k_x, k_p = jax.random.split(key)
    x = jax.random.normal(k_x, (batch, p_dims[0]), jnp.float32)
    w1, b1, w2, b2 = init_decoder_params(k_p, p_dims)

    params = prepare_decoder_params(w1, b1, w2, b2, tn=128)
    out = decoder_forward(x, params, tm=16)
    out = jax.block_until_ready(out)

    ref = decoder_reference(x, w1, b1, w2, b2)
    assert out.shape == (batch, p_dims[2])
    # Layer 1 runs in f32; only the large layer-2 matmul uses bf16 inputs with
    # f32 accumulation -> modest tolerance vs the f32 reference.
    assert jnp.allclose(out, ref, atol=2e-2, rtol=2e-2), "mismatch vs JAX reference"

    print("KERNEL_OK")
</pallas_src>

<mosaic_0001>
module attributes {stable_mosaic.version = 11 : i64} {
  func.func @layer1_kernel(%arg0: i32, %arg1: memref<16x128xf32, #tpu.memory_space<vmem>>, %arg2: memref<128x256xf32, #tpu.memory_space<vmem>>, %arg3: memref<1x256xf32, #tpu.memory_space<vmem>>, %arg4: memref<16x256xbf16, #tpu.memory_space<vmem>>) attributes {dimension_semantics = [#tpu.dimension_semantics<parallel>], iteration_bounds = array<i64: 3>, scalar_prefetch = 0 : i64, scratch_operands = 0 : i64, tpu.core_type = #tpu.core_type<tc>, window_params = [{transform_indices = @transform_0, window_bounds = array<i64: 16, 128>}, {pipeline_mode = #tpu.pipeline_mode<synchronous>, transform_indices = @transform_1, window_bounds = array<i64: 128, 256>}, {pipeline_mode = #tpu.pipeline_mode<synchronous>, transform_indices = @transform_2, window_bounds = array<i64: 1, 256>}, {transform_indices = @transform_3, window_bounds = array<i64: 16, 256>}]} {
    %c0 = arith.constant 0 : index
    %c0_0 = arith.constant 0 : index
    %0 = vector.load %arg1[%c0, %c0_0] : memref<16x128xf32, #tpu.memory_space<vmem>>, vector<16x128xf32>
    %c0_1 = arith.constant 0 : index
    %c0_2 = arith.constant 0 : index
    %1 = vector.load %arg2[%c0_1, %c0_2] : memref<128x256xf32, #tpu.memory_space<vmem>>, vector<128x256xf32>
    %cst = arith.constant dense<0.000000e+00> : vector<16x256xf32>
    %2 = tpu.matmul %0, %1, %cst {dimension_numbers = #tpu.dot_dimension_numbers<[1], [0], [0], [1], [0, 0, 1, 1], [], []>} : vector<16x128xf32>, vector<128x256xf32>, vector<16x256xf32> -> vector<16x256xf32>
    %c0_3 = arith.constant 0 : index
    %c0_4 = arith.constant 0 : index
    %3 = vector.load %arg3[%c0_3, %c0_4] : memref<1x256xf32, #tpu.memory_space<vmem>>, vector<1x256xf32>
    %4 = vector.broadcast %3 : vector<1x256xf32> to vector<16x256xf32>
    %5 = arith.addf %2, %4 : vector<16x256xf32>
    %6 = math.tanh %5 : vector<16x256xf32>
    %7 = arith.truncf %6 : vector<16x256xf32> to vector<16x256xbf16>
    %c0_5 = arith.constant 0 : index
    %c0_6 = arith.constant 0 : index
    %8 = vector.load %arg4[%c0_5, %c0_6] : memref<16x256xbf16, #tpu.memory_space<vmem>>, vector<16x256xbf16>
    tpu.vector_store %arg4[%c0_5, %c0_6], %7 {strides = array<i32>} : memref<16x256xbf16, #tpu.memory_space<vmem>>, vector<16x256xbf16>,
    return
  }
  func.func @transform_0(%arg0: i32) -> (i32, i32) {
    %c0_i32 = arith.constant 0 : i32
    %c0_i32_0 = arith.constant 0 : i32
    return %arg0, %c0_i32 : i32, i32
  }
  func.func @transform_1(%arg0: i32) -> (i32, i32) {
    %c0_i32 = arith.constant 0 : i32
    %c0_i32_0 = arith.constant 0 : i32
    %c0_i32_1 = arith.constant 0 : i32
    return %c0_i32, %c0_i32_0 : i32, i32
  }
  func.func @transform_2(%arg0: i32) -> (i32, i32) {
    %c0_i32 = arith.constant 0 : i32
    %c0_i32_0 = arith.constant 0 : i32
    %c0_i32_1 = arith.constant 0 : i32
    return %c0_i32, %c0_i32_0 : i32, i32
  }
  func.func @transform_3(%arg0: i32) -> (i32, i32) {
    %c0_i32 = arith.constant 0 : i32
    %c0_i32_0 = arith.constant 0 : i32
    return %arg0, %c0_i32 : i32, i32
  }
}

</mosaic_0001>

<bundles_post_ra>
// kernel: tpu_custom_call.1
= control target key start
LH: loop header
LB: loop body
LE: loop exit
PB: predicated region body
PF: predicated region fallthrough
CT: control target
= control target key end

     0   :  { %8 = vsyncpa [#allocation3], 0  ;;  %s952_s0 = inlined_call_operand.hbm [shape: f32[48,128], index: 0, kind: input, shape index: {}]   ;;  %s953_s1 = inlined_call_operand.hbm [shape: f32[128,256], index: 1, kind: input, shape index: {}]   ;;  %s954_s2 = inlined_call_operand.vmem [shape: f32[1,256], index: 2, kind: input, shape index: {}]   ;;  %s955_s3 = inlined_call_operand.hbm [shape: bf16[48,256], index: 3, kind: output, shape index: {}]  }
   0x1   :  { %10 = vsyncpa [#allocation3 + $0x1], 0 }
   0x2   :  { %11 = vsyncpa [#allocation6], 0 }
   0x3   :  { %12 = vsyncpa [#allocation4], 0 }
   0x4   :  { %14 = vsyncpa [#allocation4 + $0x1], 0  ;;  %s749_s12 = smov 0   ;;  %s751_s13 = smov 0  }
   0x5   :  { %s753_s14 = smov 0   ;;  %s755_s15 = smov 0  }
   0x6 LB: > { %s770_s16 = sadd.s32 4294967295, %s717_s15   ;;  %s445_s17 = sadd.s32 4294967294, %s717_s15   ;;  %s717_s15 = sphi %s755_s15, %s974_s15   ;;  %s713_s14 = sphi %s753_s14, %s973_s14   ;;  %s709_s13 = sphi %s751_s13, %s972_s13   ;;  %s705_s12 = sphi %s749_s12, %s971_s12  }
   0x7   : > { %p40_p0 = scmp.ne.s32.totalorder %s709_s13, %s705_s12  ;;  %p956_p1 = scmp.eq.s32.totalorder %s770_s16, 0 }
   0x8   : > { %p112_p3 = scmp.eq.s32.totalorder %s445_s17, 2  ;;  %p446_p5 = scmp.ge.s32.totalorder %s717_s15, 1 }
   0x9   : > { %p779_p4 = por %p956_p1, %p40_p0  ;;  %p119_p7 = scmp.lt.s32.totalorder %s717_s15, 4 }
   0xa   : > { %p784_p6 = por %p112_p3, %p40_p0  ;;  %s719_s21 = smov [#allocation5]  }
   0xb   : > { %s959_s18 = scalar_select %p779_p4, 1, 0 }
   0xc   : > { %s960_s19 = scalar_select %p784_p6, 1, 0 }
   0xd   : > { %p789_p8 = pnand %p446_p5, %p119_p7  ;;  %s131_s22 = sshll.u32 %s719_s21, 4  ;;  %s132_s22 = int_to_ptr.vmem [resolvable:$true] %s131_s22 }
   0xe   : > { %s802_s24 = sadd.s32 1, %s717_s15   ;;  %s27_s25 = sadd.s32 1, %s713_s14 }
   0xf   : > { %s961_s20 = scalar_select %p789_p8, 1, 0 }
  0x10   : > { %p525_p9 = pneg %p789_p8  ;;  %s24_s26 = ssub.s32 %s717_s15, %s802_s24 }
  0x11   : > { %s589_s29 = scalar_lea.hbm %s953_s1, 4096 }
  0x12   : > { %p797_p10 = pnand %p525_p9, %p956_p1  ;;  %p590_p11 = scmp.ne.s32.totalorder %s953_s1, %s589_s29 }
  0x13   : > { %p596_p3 = scmp.lt.u32.totalorder %s589_s29, %s953_s1 }
  0x14   : > { %p591_p12 = pneg %p797_p10 }
  0x16   : > { %p592_p13 = pnand %p591_p12, %p590_p11 }
  0x18   : > { %p593_p0 = pneg %p592_p13 }
  0x1a   : > { %p598_p5 = pnand %p596_p3, %p593_p0 }
  0x1c   : > { %601 = shalt.err (!%p598_p5)
}
  0x1d   : > { %s602_s7 = scalar_lea.vmem %s132_s22, 4096  ;;  %p610_p2 = scmp.lt.s32.totalorder %s132_s22, %s132_s22 }
  0x1e   : > { %p603_p7 = scmp.ne.s32.totalorder %s132_s22, %s602_s7  ;;  %p611_p6 = scmp.lt.s32.totalorder %s602_s7, %s602_s7 }
  0x20   : > { %p605_p9 = pnand %p603_p7, %p591_p12  ;;  %p612_p4 = por %p611_p6, %p610_p2 }
  0x22   : > { %p606_p1 = pneg %p605_p9 }
  0x24   : > { %p613_p8 = pnand %p612_p4, %p606_p1 }
  0x26   : > { %616 = shalt.err (!%p613_p8)
}
  0x27   : > { %s720_s8 = smov 256   ;;  %s721_s9 = smov 16  }
  0x28   : > { %528 = dma.hbm_to_vmem [thread:$0]  (!%p797_p10), %s953_s1, 4096, %s132_s22, [#allocation6], %s720_s8, %s720_s8, %s721_s9  }
  0x29   : > { %p25_p11 = scmp.eq.s32.totalorder %s24_s26, 0  ;;  %p34_p2 = scmp.ne.s32.totalorder %s713_s14, %s709_s13 }
  0x2a   : > { %p35_p1 = scmp.eq.s32.totalorder %s717_s15, 0  ;;  %p538_p4 = scmp.lt.s32.totalorder %s717_s15, 3 }
  0x2b   : > { %s828_s17 = scalar_select %p25_p11, %s713_s14, %s27_s25  }
  0x2c   : > { %p36_p6 = por %p35_p1, %p34_p2  ;;  %p963_p8 = scmp.eq.s32.totalorder %s770_s16, 2 }
  0x2d   : > { %s148_s27 = sand.u32 1, %s713_s14   ;;  %s464_s28 = sshll.u32 %s717_s15, 8 }
  0x2e   : > { %p832_p12 = por %p963_p8, %p34_p2  ;;  %s449_s29 = sshll.u32 %s148_s27, 4 }
  0x2f   : > { %s841_s4 = scalar_lea.hbm %s952_s0, %s464_s28  ;;  %s152_s22 = scalar_lea.vmem [#allocation2], %s449_s29 }
  0x30   : > { %s159_s25 = sshll.u32 %s152_s22, 4  ;;  %p843_p10 = pnand %p538_p4, %p36_p6  ;;  %s847_s25 = int_to_ptr.vmem [resolvable:$true] %s159_s25 }
  0x31   : > { %s849_s5 = scalar_lea.sflag [#allocation3], %s148_s27  ;;  %s617_s6 = scalar_lea.hbm %s841_s4, 256 }
  0x32   : > { %p618_p13 = scmp.ne.s32.totalorder %s841_s4, %s617_s6  ;;  %p619_p0 = pneg %p843_p10 }
  0x33   : > { %s622_s9 = scalar_lea.hbm %s952_s0, 768  ;;  %p623_p7 = scmp.lt.u32.totalorder %s841_s4, %s952_s0 }
  0x34   : > { %p620_p3 = pnand %p619_p0, %p618_p13  ;;  %p624_p9 = scmp.lt.u32.totalorder %s622_s9, %s617_s6 }
  0x35   : > { %p626_p2 = scmp.lt.u32.totalorder %s617_s6, %s841_s4 }
  0x36   : > { %p621_p5 = pneg %p620_p3  ;;  %p625_p11 = por %p624_p9, %p623_p7 }
  0x38   : > { %p627_p1 = por %p626_p2, %p625_p11 }
  0x3a   : > { %p628_p4 = pnand %p627_p1, %p621_p5 }
  0x3c   : > { %631 = shalt.err (!%p628_p4)
}
  0x3d   : > { %s632_s27 = scalar_lea.vmem %s847_s25, 256  ;;  %s722_s28 = smov [#allocation2]  }
  0x3e   : > { %p633_p6 = scmp.ne.s32.totalorder %s847_s25, %s632_s27  ;;  %s637_s29 = sshll.u32 %s722_s28, 4  ;;  %s638_s29 = int_to_ptr.vmem [resolvable:$false] %s637_s29 }
  0x3f   : > { %s639_s23 = scalar_lea.vmem %s638_s29, 512  ;;  %p640_p3 = scmp.lt.s32.totalorder %s847_s25, %s638_s29 }
  0x40   : > { %p635_p8 = pnand %p633_p6, %p619_p0  ;;  %p641_p7 = scmp.lt.s32.totalorder %s639_s23, %s632_s27 }
  0x42   : > { %p636_p13 = pneg %p635_p8  ;;  %p642_p9 = por %p641_p7, %p640_p3 }
  0x44   : > { %p643_p11 = pnand %p642_p9, %p636_p13 }
  0x46   : > { %646 = shalt.err (!%p643_p11)
}
  0x47   : > { %s723_s30 = smov 128   ;;  %s724_s22 = smov 8  }
  0x48   : > { %532 = dma.hbm_to_vmem [thread:$0]  (!%p843_p10), %s841_s4, 256, %s847_s25, %s849_s5, %s723_s30, %s723_s30, %s724_s22  }
  0x49   : > { %p966_p0 = scmp.ne.s32.totalorder %s961_s20, 0 }
  0x4a   : > { %s880_s6 = sand.u32 (!%p966_p0), 1, %s709_s13   ;;  %p967_p5 = scmp.ne.s32.totalorder (!%p966_p0), %s959_s18, 0 }
  0x4b   : > { %171 = sbr.rel (%p966_p0) target bundleno = 366 (0x16e), region = 32  ;;  %s453_s7 = sshll.u32 (!%p966_p0), %s880_s6, 4 }
  0x4c   : > { %s174_s8 = scalar_lea.sflag (!%p966_p0), [#allocation3], %s880_s6  ;;  %s886_s9 = scalar_lea.vmem (!%p966_p0), [#allocation2], %s453_s7 }
  0x52   : > { %692 = dma.done.wait (%p967_p5), %s174_s8, 256  }
  0x53   : > { %694 = vsyncadd (%p967_p5), %s174_s8, 4294967040  ;;  %p968_p10 = scmp.eq.s32.totalorder %s770_s16, 0 }
  0x55   : > { %696 = dma.done.wait (%p968_p10), [#allocation6], 4096   ;;  %p969_p2 = pmov %p968_p10 }
  0x56   : > { %v725_v0 = vmov 0.0   ;;  %v209_v1 = vld [vmem:[#allocation5 + $0x8] sm:$0xff]  ;;  %v211_v2 = vld [vmem:[#allocation5 + $0x18] sm:$0xff]  ;;  %v208_v3 = vld [vmem:[#allocation5] sm:$0xff]  ;;  %v242_v51 = vlaneseq  ;;  %s468_s4 = sshll.u32 %s770_s16, 8  ;;  %s203_s25 = scalar_lea.vmem [#allocation7], %s453_s7 }
  0x57   : > { %698 = vsyncadd (%p969_p2), [#allocation6], 4294963200  ;;  %316 = vmatprep.mubr.f32.mxu0 %v725_v0  ;;  %322 = vmatprep.mubr.f32.mxu1 %v725_v0  ;;  %v469_v4 = vpack.c.bf16 %v211_v2, %v209_v1  ;;  %v210_v5 = vld [vmem:[#allocation5 + $0x10] sm:$0xff]  ;;  %v213_v6 = vld [vmem:[#allocation5 + $0x28] sm:$0xff]  ;;  %s362_s26 = sshll.u32 %s203_s25, 4  ;;  %s907_s11 = scalar_lea.hbm %s955_s3, %s468_s4  ;;  %s909_s26 = int_to_ptr.vmem [resolvable:$true] %s362_s26 }
  0x58   : > { %v215_v7 = vld [vmem:[#allocation5 + $0x38] sm:$0xff]  ;;  %v471_v8 = vpack.c.bf16 %v210_v5, %v208_v3  ;;  %v212_v10 = vld [vmem:[#allocation5 + $0x20] sm:$0xff]  ;;  %v214_v11 = vld [vmem:[#allocation5 + $0x30] sm:$0xff]  ;;  %v243_v52 = vshrl.u32 %v242_v51, 7  ;;  %s348_s16 = scalar_lea.sflag [#allocation4], %s880_s6  ;;  %s647_s27 = scalar_lea.vmem %s909_s26, 256 }
  0x59   : > { %v473_v9 = vpack.c.bf16 %v215_v7, %v213_v6  ;;  %v217_v12 = vld [vmem:[#allocation5 + $0x48] sm:$0xff]  ;;  %470 = vmatprep.subr.bf16.mxu0 %v469_v4  ;;  %501 = vmatprep.subr.bf16.mxu1 %v469_v4  ;;  %v219_v13 = vld [vmem:[#allocation5 + $0x58] sm:$0xff]  ;;  %v475_v14 = vpack.c.bf16 %v214_v11, %v212_v10  ;;  %v216_v16 = vld [vmem:[#allocation5 + $0x40] sm:$0xff]  ;;  %p648_p1 = scmp.ne.s32.totalorder %s909_s26, %s647_s27  ;;  %s726_s28 = smov [#allocation7]  }
  0x5a   : > { %472 = vmatpush1.bf16.msra.mxu0 %v471_v8  ;;  %509 = vmatpush1.bf16.msra.mxu1 %v471_v8  ;;  %v477_v15 = vpack.c.bf16 %v219_v13, %v217_v12  ;;  %v218_v17 = vld [vmem:[#allocation5 + $0x50] sm:$0xff]  ;;  %v221_v18 = vld [vmem:[#allocation5 + $0x68] sm:$0xff]  ;;  %v223_v19 = vld [vmem:[#allocation5 + $0x78] sm:$0xff]  ;;  %v244_v53 = vsub.s32 0, %v243_v52  ;;  %v248_v55 = vsub.s32 1, %v243_v52  ;;  %s651_s29 = sshll.u32 %s726_s28, 4  ;;  %s652_s29 = int_to_ptr.vmem [resolvable:$false] %s651_s29 }
  0x5b   : > { %474 = vmatprep.subr.bf16.mxu0 %v473_v9  ;;  %502 = vmatprep.subr.bf16.mxu1 %v473_v9  ;;  %v479_v20 = vpack.c.bf16 %v218_v17, %v216_v16  ;;  %v481_v21 = vpack.c.bf16 %v223_v19, %v221_v18  ;;  %v220_v22 = vld [vmem:[#allocation5 + $0x60] sm:$0xff]  ;;  %v222_v23 = vld [vmem:[#allocation5 + $0x70] sm:$0xff]  ;;  %v225_v24 = vld [vmem:[#allocation5 + $0x88] sm:$0xff]  ;;  %p649_p4 = pnand %p648_p1, %p832_p12  ;;  %s653_s23 = scalar_lea.vmem %s652_s29, 512 }
  0x5c   : > { %v227_v25 = vld [vmem:[#allocation5 + $0x98] sm:$0xff]  ;;  %v483_v26 = vpack.c.bf16 %v222_v23, %v220_v22  ;;  %v224_v28 = vld [vmem:[#allocation5 + $0x80] sm:$0xff]  ;;  %v226_v29 = vld [vmem:[#allocation5 + $0x90] sm:$0xff]  ;;  %p654_p8 = scmp.lt.s32.totalorder %s909_s26, %s652_s29  ;;  %p655_p13 = scmp.lt.s32.totalorder %s653_s23, %s647_s27 }
  0x5d   : > { %v485_v27 = vpack.c.bf16 %v227_v25, %v225_v24  ;;  %v229_v30 = vld [vmem:[#allocation5 + $0xa8] sm:$0xff]  ;;  %v231_v31 = vld [vmem:[#allocation5 + $0xb8] sm:$0xff]  ;;  %v487_v32 = vpack.c.bf16 %v226_v29, %v224_v28  ;;  %v228_v34 = vld [vmem:[#allocation5 + $0xa0] sm:$0xff]  ;;  %p650_p6 = pneg %p649_p4 }
  0x5e   : > { %476 = vmatpush1.bf16.msra.mxu0 %v475_v14  ;;  %510 = vmatpush1.bf16.msra.mxu1 %v475_v14  ;;  %v489_v33 = vpack.c.bf16 %v231_v31, %v229_v30  ;;  %v230_v35 = vld [vmem:[#allocation5 + $0xb0] sm:$0xff]  ;;  %v233_v36 = vld [vmem:[#allocation5 + $0xc8] sm:$0xff]  ;;  %v235_v37 = vld [vmem:[#allocation5 + $0xd8] sm:$0xff]  ;;  %p656_p3 = por %p655_p13, %p654_p8 }
  0x5f   : > { %478 = vmatprep.subr.bf16.mxu0 %v477_v15  ;;  %503 = vmatprep.subr.bf16.mxu1 %v477_v15  ;;  %v491_v38 = vpack.c.bf16 %v230_v35, %v228_v34  ;;  %v493_v39 = vpack.c.bf16 %v235_v37, %v233_v36  ;;  %v232_v40 = vld [vmem:[#allocation5 + $0xc0] sm:$0xff]  ;;  %v234_v41 = vld [vmem:[#allocation5 + $0xd0] sm:$0xff]  ;;  %v237_v42 = vld [vmem:[#allocation5 + $0xe8] sm:$0xff] }
  0x60   : > { %v239_v43 = vld [vmem:[#allocation5 + $0xf8] sm:$0xff]  ;;  %v495_v44 = vpack.c.bf16 %v234_v41, %v232_v40  ;;  %v236_v46 = vld [vmem:[#allocation5 + $0xe0] sm:$0xff]  ;;  %v238_v47 = vld [vmem:[#allocation5 + $0xf0] sm:$0xff]  ;;  %p657_p7 = pnand %p656_p3, %p650_p6 }
  0x61   : > { %v497_v45 = vpack.c.bf16 %v239_v43, %v237_v42  ;;  %v499_v48 = vpack.c.bf16 %v238_v47, %v236_v46  ;;  %v206_v49 = vld [vmem:[%s886_s9] sm:$0xff]  ;;  %v207_v50 = vld [vmem:[%s886_s9 + $0x8] sm:$0xff] }
  0x62   : > { %480 = vmatpush1.bf16.msra.mxu0 %v479_v20  ;;  %511 = vmatpush1.bf16.msra.mxu1 %v479_v20  ;;  %v240_v54 = vld [vmem:[%s954_s2] sm:$0x3] }
  0x63   : > { %482 = vmatprep.subr.bf16.mxu0 %v481_v21  ;;  %504 = vmatprep.subr.bf16.mxu1 %v481_v21  ;;  %v245_v56 = vrot.slane %v240_v54, %v244_v53  ;;  %v249_v57 = vrot.slane %v240_v54, %v248_v55 }
  0x66   : > { %484 = vmatpush1.bf16.msra.mxu0 %v483_v26  ;;  %512 = vmatpush1.bf16.msra.mxu1 %v483_v26 }
  0x67   : > { %486 = vmatprep.subr.bf16.mxu0 %v485_v27  ;;  %505 = vmatprep.subr.bf16.mxu1 %v485_v27 }
  0x6a   : > { %488 = vmatpush1.bf16.msra.mxu0 %v487_v32  ;;  %513 = vmatpush1.bf16.msra.mxu1 %v487_v32 }
  0x6b   : > { %490 = vmatprep.subr.bf16.mxu0 %v489_v33  ;;  %506 = vmatprep.subr.bf16.mxu1 %v489_v33 }
  0x6e   : > { %492 = vmatpush1.bf16.msra.mxu0 %v491_v38  ;;  %514 = vmatpush1.bf16.msra.mxu1 %v491_v38 }
  0x6f   : > { %494 = vmatprep.subr.bf16.mxu0 %v493_v39  ;;  %507 = vmatprep.subr.bf16.mxu1 %v493_v39 }
  0x72   : > { %496 = vmatpush1.bf16.msra.mxu0 %v495_v44  ;;  %515 = vmatpush1.bf16.msra.mxu1 %v495_v44 }
  0x73   : > { %498 = vmatprep.subr.bf16.mxu0 %v497_v45  ;;  %508 = vmatprep.subr.bf16.mxu1 %v497_v45 }
  0x76   : > { %500 = vmatpush1.bf16.msra.mxu0 %v499_v48  ;;  %516 = vmatpush1.bf16.msra.mxu1 %v499_v48 }
  0x79   : > { %317 = vmatmul.mubr.f32.vlgmr.msra.gmra.mrb[0].mxu0 %v206_v49  ;;  %323 = vmatmul.mubr.f32.vlgmr.msra.gmra.mrb[0].mxu1 %v207_v50 }
 0x14c   : > { %v318_v58 = vpop.f32.mrb[0].mxu0  ;;  %v324_v59 = vpop.f32.mrb[0].mxu1 }
 0x14d   : > { %v319_v60 = vadd.f32 %v318_v58, %v245_v56  ;;  %v325_v61 = vadd.f32 %v324_v59, %v245_v56  ;;  %v320_v62 = vpop.f32.mrb[1].mxu0  ;;  %v326_v63 = vpop.f32.mrb[1].mxu1 }
 0x14e   : > { %v321_v0 = vadd.f32 %v320_v62, %v249_v57  ;;  %v327_v1 = vadd.f32 %v326_v63, %v249_v57 }
 0x14f   : > { %581 = vtanh.f32 %v319_v60 }
 0x150   : > { %583 = vtanh.f32 %v325_v61 }
 0x151   : > { %585 = vtanh.f32 %v321_v0 }
 0x152   : > { %587 = vtanh.f32 %v327_v1 }
 0x159   : > { %v582_v2 = vpop.eup %581 }
 0x15a   : > { %v584_v3 = vpop.eup %583 }
 0x15b   : > { %v586_v4 = vpop.eup %585 }
 0x15c   : > { %v588_v5 = vpop.eup %587  ;;  %v465_v6 = vpack.c.bf16 %v586_v4, %v582_v2 }
 0x15d   : > { %v466_v7 = vpack.c.bf16 %v588_v5, %v584_v3 }
 0x15e   : > { %345 = vst [vmem:[%s203_s25] sm:$0xff] %v465_v6 }
 0x15f   : > { %346 = vst [vmem:[%s203_s25 + $0x8] sm:$0xff] %v466_v7 }
 0x160   : > { %660 = shalt.err (!%p657_p7)
}
 0x161   : > { %s661_s30 = scalar_lea.hbm %s907_s11, 256  ;;  %s665_s8 = scalar_lea.hbm %s955_s3, 768 }
 0x162   : > { %p662_p9 = scmp.ne.s32.totalorder %s907_s11, %s661_s30  ;;  %p666_p5 = scmp.lt.u32.totalorder %s907_s11, %s955_s3 }
 0x163   : > { %p667_p10 = scmp.lt.u32.totalorder %s665_s8, %s661_s30  ;;  %p669_p1 = scmp.lt.u32.totalorder %s661_s30, %s907_s11 }
 0x164   : > { %p663_p11 = pnand %p662_p9, %p832_p12 }
 0x165   : > { %p668_p2 = por %p667_p10, %p666_p5 }
 0x166   : > { %p664_p0 = pneg %p663_p11 }
 0x167   : > { %p670_p4 = por %p669_p1, %p668_p2 }
 0x169   : > { %p671_p6 = pnand %p670_p4, %p664_p0 }
 0x16b   : > { %674 = shalt.err (!%p671_p6)
}
 0x16c   : > { %s727_s20 = smov 128   ;;  %s728_s4 = smov 8  }
 0x16d   : > { %523 = dma.vmem_to_hbm [thread:$0]  (%p832_p12), %s909_s26, 256, %s907_s11, %s348_s16, %s727_s20, %s727_s20, %s728_s4  }
 0x16e PF: > { %p540_p8 = scmp.ge.s32.totalorder %s717_s15, 2  ;;  %s377_s25 = sand.u32 1, %s705_s12  }
 0x16f   : > { %p970_p13 = scmp.ne.s32.totalorder %s960_s19, 0  ;;  %s378_s5 = scalar_lea.sflag [#allocation4], %s377_s25 }
 0x171   : > { %p534_p3 = pnand %p540_p8, %p970_p13 }
 0x173   : > { %700 = dma.done.wait (!%p534_p3), %s378_s5, 256  }
 0x174   : > { %702 = vsyncadd (!%p534_p3), %s378_s5, 4294967040  ;;  %p17_p7 = scmp.ge.s32.totalorder %s802_s24, 5   ;;  %s971_s12 = smov %s709_s13 }
 0x175   : > { %s972_s13 = smov %s713_s14  ;;  %s973_s14 = smov %s828_s17 }
 0x176   : > { %s974_s15 = smov %s802_s24  ;;  %19 = sbr.rel (!%p17_p7) target bundleno = 6 (0x6), region = 81 }
 0x17d   :  { %383 = vsyncpa [#allocation3], 1 }
 0x17e   :  { %385 = vsyncpa [#allocation3 + $0x1], 1 }
 0x17f   :  { %386 = vsyncpa [#allocation6], 1 }
 0x180   :  { %387 = vsyncpa [#allocation4], 1 }
 0x181   :  { %389 = vsyncpa [#allocation4 + $0x1], 1 }

</bundles_post_ra>
